<compile_context>
chip_gen: v5e
topology: v5e:2x2
jax: 0.10.0
libtpu: 0.0.40
codegen_flags: <defaults>
</compile_context>

<pallas_src>
import math

import jax
import jax.numpy as jnp
from jax import lax
from jax.experimental import pallas as pl
from jax.experimental.pallas import tpu as pltpu


def _make_sine_pe(dim: int, max_len: int) -> jnp.ndarray:
    """Deterministic sinusoidal positional-encoding table, shape [1, max_len, dim]."""
    rest = dim % 2
    d = dim + rest
    position = jnp.arange(0, max_len, dtype=jnp.float32)[:, None]            # [max_len, 1]
    div_term = jnp.exp(
        jnp.arange(0, d, 2, dtype=jnp.float32) * (-math.log(10000.0) / d)
    )                                                                          # [d//2]
    pe = jnp.zeros((max_len, d), dtype=jnp.float32)
    pe = pe.at[:, 0::2].set(jnp.sin(position * div_term))
    pe = pe.at[:, 1::2].set(jnp.cos(position * div_term))
    pe = pe[:, :dim]
    return pe[None, :, :]                                                      # [1, max_len, dim]


def _pe_add_kernel(x_ref, pe_ref, o_ref):
    # x_ref/o_ref: (Bb, R, L) in model dtype; pe_ref: (1, R, L) f32.
    # f32 add (parity with PyTorch f32 pe buffer), broadcast over the batch dim.
    o_ref[...] = (x_ref[...].astype(jnp.float32) + pe_ref[...]).astype(o_ref.dtype)


def _vmem_capacity_bytes() -> int:
    """Per-core VMEM capacity; conservative fallback if the query is unavailable."""
    try:
        info = pltpu.get_tpu_info()
        cap = getattr(info, "vmem_capacity_bytes", None)
        if cap:
            return int(cap)
    except Exception:
        pass
    return 64 * 1024 * 1024  # v7x per-TC size; safe lower bound for v5e/v6e too


def _divisors_desc(b: int, cap: int):
    return [d for d in range(min(b, cap), 0, -1) if b % d == 0]


def _choose_tiling(B, R_total, L, itemsize, rows_flexible, block_budget):
    """Pick (Bb, R): batches per step and row-chunk size under the VMEM budget.

    Double-buffered footprint per step ~= 2 * (Bb*R*L*itemsize  [x in]
                                               + Bb*R*L*itemsize [out]
                                               + R*L*4           [pe, f32]).
    """
    for Bb in _divisors_desc(B, 8):
        per_row_bytes = 2 * (2 * Bb * itemsize + 4) * L
        if rows_flexible:
            max_rows = max(block_budget // per_row_bytes, 8)
            if R_total <= max_rows:
                return Bb, R_total                 # full row extent (always layout-legal)
            return Bb, (max_rows // 8) * 8         # multiple of 8 -> dense sublanes
        else:
            # Row extent is fixed (must equal the full last-two dims); shrink Bb to fit.
            if per_row_bytes * R_total <= block_budget or Bb == 1:
                return Bb, R_total
    return 1, R_total


def positional_encoding_forward(x: jnp.ndarray, pe: jnp.ndarray, start: int = 0) -> jnp.ndarray:
    """x: [B, T, D], pe: [1, max_len, D] (f32). Returns x + pe[:, start:start+T] in x.dtype."""
    B, T, D = x.shape
    TD = T * D
    dtype = x.dtype
    itemsize = jnp.dtype(dtype).itemsize

    # pe window for this call (kept in f32 for precision parity with the torch buffer).
    # TODO(synk): like torch indexing, out-of-range `start` is not an error here —
    # lax.dynamic_slice clamps instead of raising.
    pe_win = lax.dynamic_slice(pe, (0, start, 0), (1, T, D)).astype(jnp.float32)

    LANES = 128
    if TD % LANES == 0:
        # Lane- and sublane-dense layout: flatten T*D into (rows, 128).
        R_total, L = TD // LANES, LANES
        rows_flexible = True
    else:
        # Fallback: keep (T, D); blocks must then cover the full last two dims.
        R_total, L = T, D
        rows_flexible = False

    x_tiled = x.reshape(B, R_total, L)
    pe_tiled = pe_win.reshape(1, R_total, L)

    # Generation-aware VMEM budgeting (bigger chunks on v6e/v5e, capped for v7x).
    vmem_cap = _vmem_capacity_bytes()
    vmem_limit = max(min(vmem_cap // 2, 64 * 1024 * 1024), 16 * 1024 * 1024)
    block_budget = (vmem_limit * 3) // 4

    Bb, R = _choose_tiling(B, R_total, L, itemsize, rows_flexible, block_budget)
    n_row_chunks = pl.cdiv(R_total, R)
    n_batch_groups = pl.cdiv(B, Bb)

    out = pl.pallas_call(
        _pe_add_kernel,
        out_shape=jax.ShapeDtypeStruct((B, R_total, L), dtype),
        grid_spec=pltpu.PrefetchScalarGridSpec(
            num_scalar_prefetch=0,
            # Batch innermost: pe block index (0, c, 0) is unchanged across the inner
            # loop, so each pe chunk is DMA'd once per row chunk, not per batch group.
            grid=(n_row_chunks, n_batch_groups),
            in_specs=[
                pl.BlockSpec((Bb, R, L), lambda c, b: (b, c, 0)),   # x
                pl.BlockSpec((1, R, L), lambda c, b: (0, c, 0)),    # pe (broadcast over batch)
            ],
            out_specs=pl.BlockSpec((Bb, R, L), lambda c, b: (b, c, 0)),
        ),
        compiler_params=pltpu.CompilerParams(
            dimension_semantics=("parallel", "parallel"),
            vmem_limit_bytes=vmem_limit,
        ),
    )(x_tiled, pe_tiled)

    return out.reshape(B, T, D)


if __name__ == "__main__":
    # Small shapes consistent with the module: batch=2, seq=8, dim=32, max_len=64.
    # (At shapes this tiny a standalone kernel is overhead-dominated; it is run here
    #  purely as a correctness demo — the tiling pays off at production T*D.)
    B, T, D, MAX_LEN = 2, 8, 32, 64
    start = 3

    key = jax.random.PRNGKey(0)
    x = jax.random.normal(key, (B, T, D), dtype=jnp.float32)
    pe = _make_sine_pe(D, MAX_LEN)          # 'sine_frozen' buffer, deterministic

    out = jax.block_until_ready(positional_encoding_forward(x, pe, start=start))
    ref = x + pe[:, start:start + T]
    assert out.shape == x.shape and out.dtype == x.dtype
    assert jnp.allclose(out, ref, atol=1e-6, rtol=1e-6), "mismatch vs reference"

    # Extra small checks: multi-batch-group path and the TD % 128 != 0 fallback path.
    for i, (B2, T2, D2, s2) in enumerate([(10, 16, 48, 5), (2, 8, 20, 1)]):
        x2 = jax.random.normal(jax.random.PRNGKey(i + 1), (B2, T2, D2), dtype=jnp.float32)
        pe2 = _make_sine_pe(D2, 64)
        o2 = jax.block_until_ready(positional_encoding_forward(x2, pe2, start=s2))
        r2 = x2 + pe2[:, s2:s2 + T2]
        assert jnp.allclose(o2, r2, atol=1e-6, rtol=1e-6), f"mismatch vs reference (case {i})"

    print("KERNEL_OK")
</pallas_src>

<mosaic_0001>
module attributes {stable_mosaic.version = 11 : i64} {
  func.func @_pe_add_kernel(%arg0: i32, %arg1: i32, %arg2: memref<2x2x128xf32, #tpu.memory_space<vmem>>, %arg3: memref<1x2x128xf32, #tpu.memory_space<vmem>>, %arg4: memref<2x2x128xf32, #tpu.memory_space<vmem>>) attributes {dimension_semantics = [#tpu.dimension_semantics<parallel>, #tpu.dimension_semantics<parallel>], iteration_bounds = array<i64: 1, 1>, scalar_prefetch = 0 : i64, scratch_operands = 0 : i64, tpu.core_type = #tpu.core_type<tc>, window_params = [{transform_indices = @transform_0, window_bounds = array<i64: 2, 2, 128>}, {transform_indices = @transform_1, window_bounds = array<i64: 1, 2, 128>}, {transform_indices = @transform_2, window_bounds = array<i64: 2, 2, 128>}]} {
    %c0 = arith.constant 0 : index
    %c0_0 = arith.constant 0 : index
    %c0_1 = arith.constant 0 : index
    %0 = vector.load %arg2[%c0, %c0_0, %c0_1] : memref<2x2x128xf32, #tpu.memory_space<vmem>>, vector<2x2x128xf32>
    %c0_2 = arith.constant 0 : index
    %c0_3 = arith.constant 0 : index
    %c0_4 = arith.constant 0 : index
    %1 = vector.load %arg3[%c0_2, %c0_3, %c0_4] : memref<1x2x128xf32, #tpu.memory_space<vmem>>, vector<1x2x128xf32>
    %2 = vector.broadcast %1 : vector<1x2x128xf32> to vector<2x2x128xf32>
    %3 = arith.addf %0, %2 : vector<2x2x128xf32>
    %c0_5 = arith.constant 0 : index
    %c0_6 = arith.constant 0 : index
    %c0_7 = arith.constant 0 : index
    %4 = vector.load %arg4[%c0_5, %c0_6, %c0_7] : memref<2x2x128xf32, #tpu.memory_space<vmem>>, vector<2x2x128xf32>
    tpu.vector_store %arg4[%c0_5, %c0_6, %c0_7], %3 {strides = array<i32>} : memref<2x2x128xf32, #tpu.memory_space<vmem>>, vector<2x2x128xf32>,
    return
  }
  func.func @transform_0(%arg0: i32, %arg1: i32) -> (i32, i32, i32) {
    %c0_i32 = arith.constant 0 : i32
    %c0_i32_0 = arith.constant 0 : i32
    return %arg1, %arg0, %c0_i32 : i32, i32, i32
  }
  func.func @transform_1(%arg0: i32, %arg1: i32) -> (i32, i32, i32) {
    %c0_i32 = arith.constant 0 : i32
    %c0_i32_0 = arith.constant 0 : i32
    %c0_i32_1 = arith.constant 0 : i32
    return %c0_i32, %arg0, %c0_i32_0 : i32, i32, i32
  }
  func.func @transform_2(%arg0: i32, %arg1: i32) -> (i32, i32, i32) {
    %c0_i32 = arith.constant 0 : i32
    %c0_i32_0 = arith.constant 0 : i32
    return %arg1, %arg0, %c0_i32 : i32, i32, i32
  }
}

</mosaic_0001>

<bundles_post_ra>
// kernel: tpu_custom_call.1
= control target key start
LH: loop header
LB: loop body
LE: loop exit
PB: predicated region body
PF: predicated region fallthrough
CT: control target
= control target key end

     0   :  { %7 = vsyncpa [#allocation3], 0  ;;  %s181_s0 = inlined_call_operand.hbm [shape: f32[2,2,128], index: 0, kind: input, shape index: {}]   ;;  %s182_s1 = inlined_call_operand.hbm [shape: f32[1,2,128], index: 1, kind: input, shape index: {}]   ;;  %s183_s2 = inlined_call_operand.hbm [shape: f32[2,2,128], index: 2, kind: output, shape index: {}]  }
   0x1   :  { %8 = vsyncpa [#allocation6], 0 }
   0x2   :  { %9 = vsyncpa [#allocation4], 0  ;;  %s14_s11 = sshll.u32 %s181_s0, 4  ;;  %s152_s12 = smov [#allocation2]   ;;  %s15_s11 = int_to_ptr.hbm [resolvable:$true] %s14_s11 }
   0x3   :  { %s16_s13 = sshll.u32 %s152_s12, 4  ;;  %s28_s16 = sshll.u32 %s182_s1, 4  ;;  %s17_s13 = int_to_ptr.vmem [resolvable:$true] %s16_s13  ;;  %s29_s16 = int_to_ptr.hbm [resolvable:$true] %s28_s16 }
   0x4   :  { %s153_s17 = smov 32   ;;  %s154_s18 = smov 2  }
   0x5   :  { %22 = dma.hbm_to_vmem [thread:$0]  %s15_s11, 64, %s17_s13, [#allocation3], %s153_s17, %s153_s17, %s154_s18  }
   0x6   :  { %s155_s19 = smov [#allocation5]  }
   0x7   :  { %s30_s20 = sshll.u32 %s155_s19, 4  ;;  %s31_s20 = int_to_ptr.vmem [resolvable:$true] %s30_s20 }
   0x8   :  { %33 = dma.hbm_to_vmem [thread:$0]  %s29_s16, 32, %s31_s20, [#allocation6]  }
   0x9   :  { %146 = dma.done.wait [#allocation3], 64  }
   0xa   :  { %147 = vsyncadd [#allocation3], 4294967232 }
   0xb   :  { %148 = dma.done.wait [#allocation6], 32  }
   0xc   :  { %149 = vsyncadd [#allocation6], 4294967264  ;;  %s156_s0 = smov [#allocation7]   ;;  %s55_s24 = sshll.u32 %s183_s2, 4  ;;  %v42_v0 = vld [vmem:[#allocation2] sm:$0x3]  ;;  %s56_s24 = int_to_ptr.hbm [resolvable:$true] %s55_s24 }
   0xd   :  { %s53_s21 = sshll.u32 %s156_s0, 4  ;;  %v44_v1 = vld [vmem:[#allocation5] sm:$0x3]  ;;  %v43_v2 = vld [vmem:[#allocation2 + $0x2] sm:$0x3]  ;;  %s54_s21 = int_to_ptr.vmem [resolvable:$true] %s53_s21 }
   0xe   :  { %v45_v3 = vadd.f32 %v44_v1, %v42_v0  ;;  %v46_v4 = vadd.f32 %v44_v1, %v43_v2 }
  0x10   :  { %47 = vst [vmem:[#allocation7] sm:$0x3] %v45_v3 }
  0x11   :  { %48 = vst [vmem:[#allocation7 + $0x2] sm:$0x3] %v46_v4 }
  0x12   :  { %61 = dma.vmem_to_hbm [thread:$0]  %s54_s21, 64, %s56_s24, [#allocation4], %s153_s17, %s153_s17, %s154_s18  }
  0x13   :  { %150 = dma.done.wait [#allocation4], 64  }
  0x14   :  { %151 = vsyncadd [#allocation4], 4294967232 }
  0x15   :  { %66 = vsyncpa [#allocation3], 1 }
  0x16   :  { %67 = vsyncpa [#allocation6], 1 }
  0x17   :  { %68 = vsyncpa [#allocation4], 1 }

</bundles_post_ra>
